<compile_context>
chip_gen: v6e
topology: v6e:2x2x1
jax: 0.10.0
libtpu: 0.0.40
codegen_flags: <defaults>
</compile_context>

<pallas_src>
import functools

import jax
import jax.numpy as jnp
from jax.experimental import pallas as pl
from jax.experimental.pallas import tpu as pltpu


# ----------------------------------------------------------------------------
# helpers
# ----------------------------------------------------------------------------
def _round_up(x, m):
    return (x + m - 1) // m * m


def _choose_tile(dim, preferred, align):
    """Largest tile <= preferred that divides `dim` and is a multiple of
    `align`.  Never silently falls back to the full dimension (unless the full
    dim already fits under `preferred`).  Arrays are pre-padded so that `dim`
    is always a multiple of `align`, hence a legal tile always exists."""
    if dim <= preferred:
        return dim
    t = (preferred // align) * align
    while t > align and dim % t:
        t -= align
    return t


def _pad2(a, rows, cols):
    r, c = a.shape
    return jnp.pad(a, ((0, rows - r), (0, cols - c)))


@functools.lru_cache(maxsize=1)
def _vmem_limit():
    """Per-chip VMEM budget: 3/4 of physical (capped), 48 MiB fallback."""
    try:
        info = pltpu.get_tpu_info()
        phys = getattr(info, "vmem_capacity_bytes", None)
        if phys:
            return min(int(phys) * 3 // 4, 96 * 1024 * 1024)
    except Exception:
        pass
    return 48 * 1024 * 1024


# ----------------------------------------------------------------------------
# Kernel 1: one-time apply_mask()   out_bf16 = where(mask != 0, w, 0)
# ----------------------------------------------------------------------------
def _apply_mask_kernel(w_ref, m_ref, o_ref):
    o_ref[...] = jnp.where(m_ref[...] != 0, w_ref[...], 0.0).astype(o_ref.dtype)


def apply_mask(w, mask, *, out_dtype=jnp.bfloat16, tr_pref=256, tc_pref=512):
    """Elementwise W * M with int8 mask, tiled along rows AND columns.
    One-time setup cost (MaskedModel.apply_mask), off the per-forward path."""
    R, C = w.shape
    assert mask.shape == (R, C)
    tr = _choose_tile(R, tr_pref, 8)
    tc = _choose_tile(C, tc_pref, 128)
    return pl.pallas_call(
        _apply_mask_kernel,
        out_shape=jax.ShapeDtypeStruct((R, C), out_dtype),
        grid=(R // tr, C // tc),
        in_specs=[
            pl.BlockSpec((tr, tc), lambda i, j: (i, j)),
            pl.BlockSpec((tr, tc), lambda i, j: (i, j)),
        ],
        out_specs=pl.BlockSpec((tr, tc), lambda i, j: (i, j)),
        compiler_params=pltpu.CompilerParams(
            dimension_semantics=("parallel", "parallel"),
            vmem_limit_bytes=_vmem_limit()),
    )(w, mask)


# ----------------------------------------------------------------------------
# Kernel 2: general tiled linear   y = act(x @ W + b)
#   - bf16 MXU operands, f32 VMEM accumulator, f32 bias+tanh epilogue
#   - b can be (1, N) (bias) or (R, N) (per-row addend, used for ctx fusion)
# ----------------------------------------------------------------------------
def _linear_kernel(x_ref, w_ref, b_ref, o_ref, acc_ref, *, activation):
    k = pl.program_id(2)
    prod = jnp.dot(x_ref[...], w_ref[...], preferred_element_type=jnp.float32)

    @pl.when(k == 0)
    def _():
        acc_ref[...] = prod          # direct assign on first K-step (no zero+add)

    @pl.when(k != 0)
    def _():
        acc_ref[...] += prod

    @pl.when(k == pl.num_programs(2) - 1)
    def _():
        out = acc_ref[...] + b_ref[...].astype(jnp.float32)
        if activation == "tanh":
            out = jnp.tanh(out)      # f32 epilogue (EUP slot), v5e-safe
        o_ref[...] = out.astype(o_ref.dtype)


def fused_linear(x, w, b, *, activation=None, out_dtype=jnp.float32,
                 tm_pref=256, tn_pref=512, tk_pref=512):
    """x: [R, K] (bf16), w: [K, N] (bf16), b: (N,)/(1,N) or (R,N) f32."""
    R, K = x.shape
    K2, N = w.shape
    assert K == K2
    b = jnp.asarray(b)
    if b.ndim == 1:
        b = b.reshape(1, N)
    row_bias = b.shape[0] != 1
    assert b.shape[-1] == N and (not row_bias or b.shape[0] == R)

    Rp = _round_up(R, 16)                      # bf16-friendly sublane padding
    if Rp != R:
        x = jnp.pad(x, ((0, Rp - R), (0, 0)))
        if row_bias:
            b = jnp.pad(b, ((0, Rp - R), (0, 0)))

    tm = _choose_tile(Rp, tm_pref, 8)
    tn = _choose_tile(N, tn_pref, 128)
    tk = _choose_tile(K, tk_pref, 128)
    grid = (Rp // tm, N // tn, K // tk)

    if row_bias:
        b_spec = pl.BlockSpec((tm, tn), lambda i, j, k: (i, j))
    else:
        b_spec = pl.BlockSpec((1, tn), lambda i, j, k: (0, j))

    out = pl.pallas_call(
        functools.partial(_linear_kernel, activation=activation),
        out_shape=jax.ShapeDtypeStruct((Rp, N), out_dtype),
        grid_spec=pltpu.PrefetchScalarGridSpec(
            num_scalar_prefetch=0,
            grid=grid,
            in_specs=[
                pl.BlockSpec((tm, tk), lambda i, j, k: (i, k)),
                pl.BlockSpec((tk, tn), lambda i, j, k: (k, j)),
                b_spec,
            ],
            out_specs=pl.BlockSpec((tm, tn), lambda i, j, k: (i, j)),
            scratch_shapes=[pltpu.VMEM((tm, tn), jnp.float32)],
        ),
        compiler_params=pltpu.CompilerParams(
            dimension_semantics=("parallel", "parallel", "arbitrary"),
            vmem_limit_bytes=_vmem_limit(),
        ),
    )(x, w, b)
    return out[:R] if Rp != R else out


# ----------------------------------------------------------------------------
# Parameter / mask construction (deterministic, in-script)
# ----------------------------------------------------------------------------
MASKED_PARAMS = ("enc_emb", "enc_w", "dec_emb", "dec_w", "out_w")


def init_params(key, vocab, hidden):
    ks = jax.random.split(key, 8)
    s = 0.1
    return {
        "enc_emb": s * jax.random.normal(ks[0], (vocab, hidden), jnp.float32),
        "enc_w":   s * jax.random.normal(ks[1], (hidden, hidden), jnp.float32),
        "enc_b":   s * jax.random.normal(ks[2], (1, hidden), jnp.float32),
        "dec_emb": s * jax.random.normal(ks[3], (vocab, hidden), jnp.float32),
        "dec_w":   s * jax.random.normal(ks[4], (2 * hidden, hidden), jnp.float32),
        "dec_b":   s * jax.random.normal(ks[5], (1, hidden), jnp.float32),
        "out_w":   s * jax.random.normal(ks[6], (hidden, vocab), jnp.float32),
        "out_b":   s * jax.random.normal(ks[7], (1, vocab), jnp.float32),
    }


def make_masks(params, prune_ratio=0.5):
    """Emulate one change_mask(): keep top (1-ratio) by |value|, int8 masks."""
    masks = {}
    for name in MASKED_PARAMS:
        w = params[name]
        flat = jnp.abs(w).reshape(-1)
        n = flat.shape[0]
        k = min(max(int(n * prune_ratio), 0), n - 1)
        thresh = jnp.sort(flat)[k]
        masks[name] = (jnp.abs(w) >= thresh).astype(jnp.int8)
    return masks


def prepare_masked_params(params, masks):
    """One-time apply_mask() (Pallas) -> bf16 weights, padded to TPU-friendly
    shapes (feature dims to 128, for lane-dense outputs).  Matches
    MaskedModel.apply_mask(): weights become pretrained * mask once, and
    forward() then just uses them."""
    V, H = params["enc_emb"].shape
    Hp = _round_up(H, 128)
    Vp = _round_up(V, 128)

    def mpad(w, m, rows, cols):
        return apply_mask(_pad2(w, rows, cols), _pad2(m, rows, cols))

    wd, md = params["dec_w"], masks["dec_w"]
    return {
        "enc_emb": mpad(params["enc_emb"], masks["enc_emb"], Vp, Hp),
        "enc_w":   mpad(params["enc_w"],   masks["enc_w"],   Hp, Hp),
        "enc_b":   _pad2(params["enc_b"].reshape(1, -1), 1, Hp),
        "dec_emb": mpad(params["dec_emb"], masks["dec_emb"], Vp, Hp),
        # concat([y, ctx]) @ dec_w split into the two halves (no concat needed)
        "dec_w_y": mpad(wd[:H], md[:H], Hp, Hp),
        "dec_w_c": mpad(wd[H:], md[H:], Hp, Hp),
        "dec_b":   _pad2(params["dec_b"].reshape(1, -1), 1, Hp),
        "out_w":   mpad(params["out_w"], masks["out_w"], Hp, Vp),
        "out_b":   _pad2(params["out_b"].reshape(1, -1), 1, Vp),
    }


# ----------------------------------------------------------------------------
# Forward pass (MaskedModel.forward -> masked_model(src, tgt, lengths, dec_state))
# ----------------------------------------------------------------------------
@jax.jit
def masked_model_forward(mp, src, tgt, lengths, dec_state=None):
    # dec_state kept for interface parity; synthetic decoder is stateless.
    # TODO(synk): thread a real recurrent dec_state if the underlying OpenNMT
    # decoder is ever specified.
    del dec_state

    S, B = src.shape
    T = tgt.shape[0]
    Hp = mp["enc_w"].shape[0]
    Vp = mp["out_w"].shape[1]

    # ---- encoder: gather pre-masked bf16 embedding rows (token-proportional)
    x = jnp.take(mp["enc_emb"], src.reshape(-1), axis=0)          # [S*B, Hp] bf16
    h = fused_linear(x, mp["enc_w"], mp["enc_b"], activation="tanh",
                     out_dtype=jnp.bfloat16)                      # bias+tanh fused
    h = h.reshape(S, B, Hp)

    # length-masked mean pool over time -> context [B, Hp] (tiny; f32 accum)
    pos = jnp.arange(S, dtype=jnp.int32)[:, None]                 # [S, 1]
    valid = (pos < lengths[None, :]).astype(jnp.float32)          # [S, B]
    denom = jnp.maximum(lengths, 1).astype(jnp.float32)           # zero-length guard
    ctx = (h.astype(jnp.float32) * valid[..., None]).sum(axis=0) / denom[:, None]

    # ---- decoder ----
    # ctx projection + decoder bias: tiny [B, Hp] matmul, computed once.
    ctx_proj = fused_linear(ctx.astype(jnp.bfloat16), mp["dec_w_c"],
                            mp["dec_b"])                          # [B, Hp] f32

    # Flatten B*T into the M axis (time-major, so no transposes anywhere):
    #   d = tanh(y @ W_dy + ctx_proj[row])   -- per-row addend fused in-kernel
    #   logits = d @ W_out + b_out           -- ONE pass over W_out, big M
    y = jnp.take(mp["dec_emb"], tgt.reshape(-1), axis=0)          # [T*B, Hp] bf16
    addend = jnp.broadcast_to(ctx_proj[None], (T, B, Hp)).reshape(T * B, Hp)
    d = fused_linear(y, mp["dec_w_y"], addend, activation="tanh",
                     out_dtype=jnp.bfloat16)                      # [T*B, Hp] bf16
    logits = fused_linear(d, mp["out_w"], mp["out_b"])            # [T*B, Vp] f32
    return logits.reshape(T, B, Vp)                               # time-major, free


# ----------------------------------------------------------------------------
# Pure-JAX reference (original concat formulation) for correctness check.
# Weights / intermediate activations are bf16-rounded exactly where the Pallas
# path quantizes them; matmul accumulation stays f32.
# ----------------------------------------------------------------------------
def reference_forward(params, masks, src, tgt, lengths):
    f32 = jnp.float32

    def q(a):                                   # bf16 quantization (round trip)
        return a.astype(jnp.bfloat16).astype(f32)

    def mq(name):                               # masked + bf16-quantized weight
        return q(params[name] * masks[name].astype(f32))

    H = params["enc_w"].shape[0]
    x = jnp.take(mq("enc_emb"), src, axis=0)                      # [S, B, H]
    S, B, _ = x.shape
    h = q(jnp.tanh(x.reshape(S * B, H) @ mq("enc_w")
                   + params["enc_b"].reshape(1, -1))).reshape(S, B, H)
    pos = jnp.arange(S, dtype=jnp.int32)[:, None]
    valid = (pos < lengths[None, :]).astype(f32)
    denom = jnp.maximum(lengths, 1).astype(f32)
    ctx = (h * valid[..., None]).sum(0) / denom[:, None]

    wd = params["dec_w"] * masks["dec_w"].astype(f32)
    wd_y, wd_c = q(wd[:H]), q(wd[H:])
    ctx_proj = q(ctx) @ wd_c + params["dec_b"].reshape(1, -1)     # [B, H]

    y = jnp.take(mq("dec_emb"), tgt, axis=0)                      # [T, B, H]
    T = y.shape[0]
    # tanh(concat([y, ctx]) @ dec_w + b) == tanh(y @ wd_y + ctx @ wd_c + b)
    d = q(jnp.tanh(y.reshape(T * B, H) @ wd_y
                   + jnp.broadcast_to(ctx_proj[None], (T, B, H)).reshape(T * B, H)))
    logits = d @ mq("out_w") + params["out_b"].reshape(1, -1)
    return logits.reshape(T, B, -1)


# ----------------------------------------------------------------------------
if __name__ == "__main__":
    key = jax.random.PRNGKey(0)
    k_param, k_src, k_tgt = jax.random.split(key, 3)

    VOCAB, HIDDEN = 64, 32
    S, T, B = 8, 8, 2

    params = init_params(k_param, VOCAB, HIDDEN)
    masks = make_masks(params, prune_ratio=0.5)

    # one-time apply_mask() (Pallas) — not on the per-forward path
    masked_params = prepare_masked_params(params, masks)

    src = jax.random.randint(k_src, (S, B), 0, VOCAB, dtype=jnp.int32)   # [S, B]
    tgt = jax.random.randint(k_tgt, (T, B), 0, VOCAB, dtype=jnp.int32)   # [T, B]
    lengths = jnp.array([8, 5], dtype=jnp.int32)                          # [B]

    out_padded = masked_model_forward(masked_params, src, tgt, lengths,
                                      dec_state=None)
    out_padded = jax.block_until_ready(out_padded)
    out = out_padded[:, :, :VOCAB]        # logical slice: drop padded vocab cols

    ref = reference_forward(params, masks, src, tgt, lengths)
    assert out.shape == (T, B, VOCAB), out.shape
    max_err = float(jnp.max(jnp.abs(out - ref)))
    assert jnp.allclose(out, ref, atol=5e-3, rtol=5e-3), max_err

    print("KERNEL_OK")
</pallas_src>

<mosaic_0001>
module attributes {stable_mosaic.version = 11 : i64} {
  func.func @_apply_mask_kernel(%arg0: i32, %arg1: i32, %arg2: memref<128x128xf32, #tpu.memory_space<vmem>>, %arg3: memref<128x128xi8, #tpu.memory_space<vmem>>, %arg4: memref<128x128xbf16, #tpu.memory_space<vmem>>) attributes {dimension_semantics = [#tpu.dimension_semantics<parallel>, #tpu.dimension_semantics<parallel>], iteration_bounds = array<i64: 1, 1>, scalar_prefetch = 0 : i64, scratch_operands = 0 : i64, tpu.core_type = #tpu.core_type<tc>, window_params = [{transform_indices = @transform_0, window_bounds = array<i64: 128, 128>}, {transform_indices = @transform_1, window_bounds = array<i64: 128, 128>}, {transform_indices = @transform_2, window_bounds = array<i64: 128, 128>}]} {
    %c0 = arith.constant 0 : index
    %c0_0 = arith.constant 0 : index
    %0 = vector.load %arg3[%c0, %c0_0] : memref<128x128xi8, #tpu.memory_space<vmem>>, vector<128x128xi8>
    %c0_i8 = arith.constant 0 : i8
    %1 = vector.broadcast %c0_i8 : i8 to vector<128x128xi8>
    %2 = arith.cmpi ne, %0, %1 : vector<128x128xi8>
    %c0_1 = arith.constant 0 : index
    %c0_2 = arith.constant 0 : index
    %3 = vector.load %arg2[%c0_1, %c0_2] : memref<128x128xf32, #tpu.memory_space<vmem>>, vector<128x128xf32>
    %cst = arith.constant 0.000000e+00 : f32
    %4 = vector.broadcast %cst : f32 to vector<128x128xf32>
    %5 = arith.select %2, %3, %4 : vector<128x128xi1>, vector<128x128xf32>
    %6 = arith.truncf %5 : vector<128x128xf32> to vector<128x128xbf16>
    %c0_3 = arith.constant 0 : index
    %c0_4 = arith.constant 0 : index
    %7 = vector.load %arg4[%c0_3, %c0_4] : memref<128x128xbf16, #tpu.memory_space<vmem>>, vector<128x128xbf16>
    tpu.vector_store %arg4[%c0_3, %c0_4], %6 {strides = array<i32>} : memref<128x128xbf16, #tpu.memory_space<vmem>>, vector<128x128xbf16>,
    return
  }
  func.func @transform_0(%arg0: i32, %arg1: i32) -> (i32, i32) {
    %c0_i32 = arith.constant 0 : i32
    return %arg0, %arg1 : i32, i32
  }
  func.func @transform_1(%arg0: i32, %arg1: i32) -> (i32, i32) {
    %c0_i32 = arith.constant 0 : i32
    return %arg0, %arg1 : i32, i32
  }
  func.func @transform_2(%arg0: i32, %arg1: i32) -> (i32, i32) {
    %c0_i32 = arith.constant 0 : i32
    return %arg0, %arg1 : i32, i32
  }
}

</mosaic_0001>

<bundles_post_ra>
// kernel: tpu_custom_call.1
= control target key start
LH: loop header
LB: loop body
LE: loop exit
PB: predicated region body
PF: predicated region fallthrough
CT: control target
= control target key end

     0   :  { %7 = vsyncpa [#allocation3], 0  ;;  %s508_s0 = inlined_call_operand.hbm [shape: f32[128,128], index: 0, kind: input, shape index: {}]   ;;  %s509_s1 = inlined_call_operand.hbm [shape: s8[128,128], index: 1, kind: input, shape index: {}]   ;;  %s510_s2 = inlined_call_operand.hbm [shape: bf16[128,128], index: 2, kind: output, shape index: {}]  }
   0x1   :  { %8 = vsyncpa [#allocation6], 0 }
   0x2   :  { %9 = vsyncpa [#allocation4], 0  ;;  %s449_s9 = smov [#allocation2]  }
   0x3   :  { %s15_s10 = sshll.u32 %s449_s9, 4  ;;  %s16_s10 = int_to_ptr.vmem [resolvable:$true] %s15_s10 }
   0x4   :  { %s391_s11 = scalar_lea.vmem %s16_s10, 2048  ;;  %p396_p1 = scmp.lt.s32.totalorder %s16_s10, %s16_s10 }
   0x5   :  { %p392_p0 = scmp.ne.s32.totalorder %s16_s10, %s391_s11  ;;  %p397_p2 = scmp.lt.s32.totalorder %s391_s11, %s391_s11 }
   0x7   :  { %p398_p3 = por %p397_p2, %p396_p1 }
   0x9   :  { %p399_p4 = pnand %p398_p3, %p392_p0 }
   0xb   :  { %402 = shalt.err (!%p399_p4)
}
   0xc   :  { %s450_s12 = smov 128   ;;  %s451_s13 = smov 8  }
   0xd   :  { %21 = dma.hbm_to_vmem [thread:$0]  %s508_s0, 2048, %s16_s10, [#allocation3], %s450_s12, %s450_s12, %s451_s13  }
   0xe   :  { %s452_s16 = smov [#allocation5]  }
   0xf   :  { %s27_s17 = sshll.u32 %s452_s16, 4  ;;  %s28_s17 = int_to_ptr.vmem [resolvable:$true] %s27_s17 }
  0x10   :  { %s411_s18 = scalar_lea.vmem %s28_s17, 512  ;;  %p416_p6 = scmp.lt.s32.totalorder %s28_s17, %s28_s17 }
  0x11   :  { %p412_p5 = scmp.ne.s32.totalorder %s28_s17, %s411_s18  ;;  %p417_p7 = scmp.lt.s32.totalorder %s411_s18, %s411_s18 }
  0x13   :  { %p418_p8 = por %p417_p7, %p416_p6 }
  0x15   :  { %p419_p9 = pnand %p418_p8, %p412_p5 }
  0x17   :  { %422 = shalt.err (!%p419_p9)
}
  0x18   :  { %33 = dma.hbm_to_vmem [thread:$0]  %s509_s1, 512, %s28_s17, [#allocation6], %s450_s12, %s450_s12, %s451_s13  }
  0x19   :  { %443 = dma.done.wait [#allocation3], 2048  }
  0x1a   :  { %444 = vsyncadd [#allocation3], 4294965248 }
  0x1b   :  { %445 = dma.done.wait [#allocation6], 512  }
  0x1c   :  { %446 = vsyncadd [#allocation6], 4294966784  ;;  %v42_v0 = vld [vmem:[#allocation5] sm:$0xff]  ;;  %v43_v1 = vld [vmem:[#allocation5 + $0x8] sm:$0xff]  ;;  %v453_v2 = vmov 0   ;;  %s454_s0 = smov [#allocation7]  }
  0x1d   :  { %vm46_vm0 = vnez %v42_v0  ;;  %vm47_vm1 = vnez %v43_v1  ;;  %v44_v8 = vld [vmem:[#allocation5 + $0x10] sm:$0xff]  ;;  %v50_v30 = vld [vmem:[#allocation2] sm:$0xff]  ;;  %v51_v31 = vld [vmem:[#allocation2 + $0x8] sm:$0xff]  ;;  %s283_s1 = sshll.u32 %s454_s0, 4  ;;  %s284_s1 = int_to_ptr.vmem [resolvable:$true] %s283_s1 }
  0x1e   :  { %v66_v3 = vsel %vm46_vm0, 16843009, %v453_v2  ;;  %v67_v9 = vsel %vm47_vm1, 16843009, %v453_v2  ;;  %vm48_vm2 = vnez %v44_v8  ;;  %v52_v34 = vld [vmem:[#allocation2 + $0x10] sm:$0xff]  ;;  %v53_v37 = vld [vmem:[#allocation2 + $0x18] sm:$0xff]  ;;  %p428_p11 = scmp.lt.s32.totalorder %s284_s1, %s284_s1 }
  0x1f   :  { %v70_v4 = vunpack.c.0.s8 %v66_v3  ;;  %v71_v5 = vunpack.c.1.s8 %v66_v3  ;;  %v72_v6 = vunpack.c.2.s8 %v66_v3  ;;  %v73_v7 = vunpack.c.3.s8 %v66_v3  ;;  %v54_v47 = vld [vmem:[#allocation2 + $0x20] sm:$0xff]  ;;  %v55_v52 = vld [vmem:[#allocation2 + $0x28] sm:$0xff]  ;;  %v56_v58 = vld [vmem:[#allocation2 + $0x30] sm:$0xff]  ;;  %s423_s21 = scalar_lea.vmem %s284_s1, 1024 }
  0x20   :  { %v74_v14 = vunpack.c.0.s8 %v67_v9  ;;  %v75_v15 = vunpack.c.1.s8 %v67_v9  ;;  %v76_v16 = vunpack.c.2.s8 %v67_v9  ;;  %v77_v17 = vunpack.c.3.s8 %v67_v9  ;;  %v45_v0 = vld [vmem:[#allocation5 + $0x18] sm:$0xff]  ;;  %p424_p10 = scmp.ne.s32.totalorder %s284_s1, %s423_s21  ;;  %p429_p12 = scmp.lt.s32.totalorder %s423_s21, %s423_s21 }
  0x21   :  { %v86_v10 = vpack.c.b16 %v70_v4, %v70_v4  ;;  %v88_v11 = vpack.c.b16 %v71_v5, %v71_v5  ;;  %v90_v12 = vpack.c.b16 %v72_v6, %v72_v6  ;;  %v92_v13 = vpack.c.b16 %v73_v7, %v73_v7  ;;  %v57_v3 = vld [vmem:[#allocation2 + $0x38] sm:$0xff] }
  0x22   :  { %v94_v22 = vpack.c.b16 %v74_v14, %v74_v14  ;;  %v96_v23 = vpack.c.b16 %v75_v15, %v75_v15  ;;  %v98_v24 = vpack.c.b16 %v76_v16, %v76_v16  ;;  %v100_v25 = vpack.c.b16 %v77_v17, %v77_v17  ;;  %p430_p13 = por %p429_p12, %p428_p11 }
  0x23   :  { %v87_v18 = vpack.c.b8 %v86_v10, %v86_v10  ;;  %v89_v19 = vpack.c.b8 %v88_v11, %v88_v11  ;;  %v91_v20 = vpack.c.b8 %v90_v12, %v90_v12  ;;  %v93_v21 = vpack.c.b8 %v92_v13, %v92_v13 }
  0x24   :  { %v95_v29 = vpack.c.b8 %v94_v22, %v94_v22  ;;  %v97_v39 = vpack.c.b8 %v96_v23, %v96_v23  ;;  %v99_v40 = vpack.c.b8 %v98_v24, %v98_v24  ;;  %v101_v51 = vpack.c.b8 %v100_v25, %v100_v25  ;;  %v58_v22 = vld [vmem:[#allocation2 + $0x40] sm:$0xff]  ;;  %p431_p0 = pnand %p430_p13, %p424_p10 }
  0x25   :  { %vm118_vm3 = vnez %v87_v18  ;;  %vm119_vm4 = vnez %v89_v19  ;;  %vm120_vm5 = vnez %v91_v20  ;;  %vm121_vm6 = vnez %v93_v21 }
  0x26   :  { %v134_v26 = vsel %vm118_vm3, 16843009, %v453_v2  ;;  %v135_v27 = vsel %vm119_vm4, 16843009, %v453_v2  ;;  %v136_v28 = vsel %vm120_vm5, 16843009, %v453_v2  ;;  %vm122_vm7 = vnez %v95_v29 }
  0x27   :  { %v150_v32 = vunpack.c.0.s8 %v134_v26  ;;  %v151_v33 = vunpack.c.0.s8 %v135_v27  ;;  %v137_v35 = vsel %vm121_vm6, 16843009, %v453_v2  ;;  %v152_v36 = vunpack.c.0.s8 %v136_v28  ;;  %v59_v26 = vld [vmem:[#allocation2 + $0x48] sm:$0xff] }
  0x28   :  { %v153_v38 = vunpack.c.0.s8 %v137_v35  ;;  %v138_v41 = vsel %vm122_vm7, 16843009, %v453_v2  ;;  %vm123_vm12 = vnez %v97_v39  ;;  %vm124_vm13 = vnez %v99_v40  ;;  %v61_v35 = vld [vmem:[#allocation2 + $0x58] sm:$0xff] }
  0x29   :  { %vm166_vm8 = vcmp.ne.s32.totalorder %v150_v32, 0  ;;  %vm167_vm9 = vcmp.ne.s32.totalorder %v151_v33, 0  ;;  %vm168_vm10 = vcmp.ne.s32.totalorder %v152_v36, 0  ;;  %v154_v48 = vunpack.c.0.s8 %v138_v41 }
  0x2a   :  { %v182_v42 = vsel %vm166_vm8, %v50_v30, 0.0  ;;  %v183_v43 = vsel %vm167_vm9, %v51_v31, 0.0  ;;  %vm169_vm11 = vcmp.ne.s32.totalorder %v153_v38, 0  ;;  %v184_v44 = vsel %vm168_vm10, %v52_v34, 0.0  ;;  %v60_v30 = vld [vmem:[#allocation2 + $0x50] sm:$0xff] }
  0x2b   :  { %v331_v45 = vpack.c.bf16 %v183_v43, %v182_v42  ;;  %v185_v46 = vsel %vm169_vm11, %v53_v37, 0.0  ;;  %v139_v50 = vsel %vm123_vm12, 16843009, %v453_v2  ;;  %vm486_vm14 = vcmp.ne.s32.totalorder %v154_v48, 0  ;;  %v63_v48 = vld [vmem:[#allocation2 + $0x68] sm:$0xff] }
  0x2c   :  { %v336_v49 = vpack.c.bf16 %v185_v46, %v184_v44  ;;  %v155_v53 = vunpack.c.0.s8 %v139_v50  ;;  %v140_v55 = vsel %vm124_vm13, 16843009, %v453_v2  ;;  %v68_v56 = vsel %vm48_vm2, 16843009, %v453_v2 }
  0x2d   :  { %332 = vst [vmem:[#allocation7] sm:$0xff] %v331_v45   ;;  %v186_v57 = vsel %vm486_vm14, %v54_v47, 0.0  ;;  %vm125_vm15 = vnez %v101_v51  ;;  %v156_v59 = vunpack.c.0.s8 %v140_v55  ;;  %v78_v60 = vunpack.c.0.s8 %v68_v56  ;;  %v62_v47 = vld [vmem:[#allocation2 + $0x60] sm:$0xff] }
  0x2e   :  { %368 = vst [vmem:[#allocation7 + $0x8] sm:$0xff] %v336_v49   ;;  %vm171_vm0 = vcmp.ne.s32.totalorder %v155_v53, 0  ;;  %v141_v61 = vsel %vm125_vm15, 16843009, %v453_v2  ;;  %v79_v62 = vunpack.c.1.s8 %v68_v56  ;;  %v80_v63 = vunpack.c.2.s8 %v68_v56 }
  0x2f   :  { %v187_v1 = vsel %vm171_vm0, %v55_v52, 0.0  ;;  %v157_v4 = vunpack.c.0.s8 %v141_v61  ;;  %vm172_vm1 = vcmp.ne.s32.totalorder %v156_v59, 0  ;;  %v102_v5 = vpack.c.b16 %v78_v60, %v78_v60  ;;  %v64_v59 = vld [vmem:[#allocation2 + $0x70] sm:$0xff] }
  0x30   :  { %v341_v6 = vpack.c.bf16 %v187_v1, %v186_v57  ;;  %v188_v7 = vsel %vm172_vm1, %v56_v58, 0.0  ;;  %v104_v8 = vpack.c.b16 %v79_v62, %v79_v62  ;;  %v81_v9 = vunpack.c.3.s8 %v68_v56  ;;  %v65_v62 = vld [vmem:[#allocation2 + $0x78] sm:$0xff] }
  0x31   :  { %vm173_vm2 = vcmp.ne.s32.totalorder %v157_v4, 0  ;;  %v103_v10 = vpack.c.b8 %v102_v5, %v102_v5  ;;  %v106_v11 = vpack.c.b16 %v80_v63, %v80_v63  ;;  %vm49_vm3 = vnez %v45_v0 }
  0x32   :  { %369 = vst [vmem:[#allocation7 + $0x10] sm:$0xff] %v341_v6   ;;  %v189_v12 = vsel %vm173_vm2, %v57_v3, 0.0  ;;  %v105_v13 = vpack.c.b8 %v104_v8, %v104_v8  ;;  %v108_v14 = vpack.c.b16 %v81_v9, %v81_v9  ;;  %v69_v15 = vsel %vm49_vm3, 16843009, %v453_v2 }
  0x33   :  { %v346_v16 = vpack.c.bf16 %v189_v12, %v188_v7  ;;  %vm126_vm4 = vnez %v103_v10  ;;  %v107_v17 = vpack.c.b8 %v106_v11, %v106_v11  ;;  %v82_v18 = vunpack.c.0.s8 %v69_v15 }
  0x34   :  { %vm127_vm5 = vnez %v105_v13  ;;  %v142_v19 = vsel %vm126_vm4, 16843009, %v453_v2  ;;  %v109_v20 = vpack.c.b8 %v108_v14, %v108_v14  ;;  %v83_v21 = vunpack.c.1.s8 %v69_v15 }
  0x35   :  { %370 = vst [vmem:[#allocation7 + $0x18] sm:$0xff] %v346_v16   ;;  %v143_v23 = vsel %vm127_vm5, 16843009, %v453_v2  ;;  %v158_v24 = vunpack.c.0.s8 %v142_v19  ;;  %vm128_vm6 = vnez %v107_v17  ;;  %v110_v25 = vpack.c.b16 %v82_v18, %v82_v18 }
  0x36   :  { %v159_v27 = vunpack.c.0.s8 %v143_v23  ;;  %vm129_vm7 = vnez %v109_v20  ;;  %v144_v28 = vsel %vm128_vm6, 16843009, %v453_v2  ;;  %v112_v29 = vpack.c.b16 %v83_v21, %v83_v21 }
  0x37   :  { %vm174_vm8 = vcmp.ne.s32.totalorder %v158_v24, 0  ;;  %v145_v31 = vsel %vm129_vm7, 16843009, %v453_v2  ;;  %v160_v32 = vunpack.c.0.s8 %v144_v28  ;;  %v111_v33 = vpack.c.b8 %v110_v25, %v110_v25 }
  0x38   :  { %vm175_vm9 = vcmp.ne.s32.totalorder %v159_v27, 0  ;;  %v190_v34 = vsel %vm174_vm8, %v58_v22, 0.0  ;;  %v161_v36 = vunpack.c.0.s8 %v145_v31  ;;  %v113_v37 = vpack.c.b8 %v112_v29, %v112_v29 }
  0x39   :  { %v191_v38 = vsel %vm175_vm9, %v59_v26, 0.0  ;;  %vm176_vm10 = vcmp.ne.s32.totalorder %v160_v32, 0  ;;  %vm130_vm11 = vnez %v111_v33  ;;  %v84_v39 = vunpack.c.2.s8 %v69_v15 }
  0x3a   :  { %v351_v40 = vpack.c.bf16 %v191_v38, %v190_v34  ;;  %vm177_vm12 = vcmp.ne.s32.totalorder %v161_v36, 0  ;;  %v192_v41 = vsel %vm176_vm10, %v60_v30, 0.0  ;;  %vm131_vm13 = vnez %v113_v37 }
  0x3b   :  { %v193_v42 = vsel %vm177_vm12, %v61_v35, 0.0  ;;  %v146_v43 = vsel %vm130_vm11, 16843009, %v453_v2  ;;  %v147_v44 = vsel %vm131_vm13, 16843009, %v453_v2  ;;  %v85_v45 = vunpack.c.3.s8 %v69_v15 }
  0x3c   :  { %371 = vst [vmem:[#allocation7 + $0x20] sm:$0xff] %v351_v40   ;;  %v356_v46 = vpack.c.bf16 %v193_v42, %v192_v41  ;;  %v162_v49 = vunpack.c.0.s8 %v146_v43  ;;  %v163_v50 = vunpack.c.0.s8 %v147_v44  ;;  %v114_v51 = vpack.c.b16 %v84_v39, %v84_v39 }
  0x3d   :  { %v116_v52 = vpack.c.b16 %v85_v45, %v85_v45 }
  0x3e   :  { %372 = vst [vmem:[#allocation7 + $0x28] sm:$0xff] %v356_v46   ;;  %vm178_vm14 = vcmp.ne.s32.totalorder %v162_v49, 0  ;;  %vm179_vm15 = vcmp.ne.s32.totalorder %v163_v50, 0  ;;  %v115_v53 = vpack.c.b8 %v114_v51, %v114_v51 }
  0x3f   :  { %v194_v54 = vsel %vm178_vm14, %v62_v47, 0.0  ;;  %v195_v55 = vsel %vm179_vm15, %v63_v48, 0.0  ;;  %v117_v56 = vpack.c.b8 %v116_v52, %v116_v52 }
  0x40   :  { %v361_v57 = vpack.c.bf16 %v195_v55, %v194_v54  ;;  %vm132_vm0 = vnez %v115_v53 }
  0x41   :  { %vm133_vm1 = vnez %v117_v56  ;;  %v148_v58 = vsel %vm132_vm0, 16843009, %v453_v2 }
  0x42   :  { %373 = vst [vmem:[#allocation7 + $0x30] sm:$0xff] %v361_v57   ;;  %v149_v60 = vsel %vm133_vm1, 16843009, %v453_v2  ;;  %v164_v61 = vunpack.c.0.s8 %v148_v58 }
  0x43   :  { %v165_v63 = vunpack.c.0.s8 %v149_v60 }
  0x44   :  { %vm180_vm2 = vcmp.ne.s32.totalorder %v164_v61, 0 }
  0x45   :  { %vm181_vm3 = vcmp.ne.s32.totalorder %v165_v63, 0  ;;  %v196_v0 = vsel %vm180_vm2, %v64_v59, 0.0 }
  0x46   :  { %v197_v1 = vsel %vm181_vm3, %v65_v62, 0.0 }
  0x47   :  { %v366_v3 = vpack.c.bf16 %v197_v1, %v196_v0 }
  0x49   :  { %374 = vst [vmem:[#allocation7 + $0x38] sm:$0xff] %v366_v3  }
  0x4a   :  { %434 = shalt.err (!%p431_p0)
}
  0x4b   :  { %s455_s22 = smov 64   ;;  %s456_s23 = smov 4  }
  0x4c   :  { %289 = dma.vmem_to_hbm [thread:$0]  %s284_s1, 1024, %s510_s2, [#allocation4], %s455_s22, %s455_s22, %s456_s23  }
  0x4d   :  { %447 = dma.done.wait [#allocation4], 1024  }
  0x4e   :  { %448 = vsyncadd [#allocation4], 4294966272 }
  0x4f   :  { %293 = vsyncpa [#allocation3], 1 }
  0x50   :  { %294 = vsyncpa [#allocation6], 1 }
  0x51   :  { %295 = vsyncpa [#allocation4], 1 }

</bundles_post_ra>
